<compile_context>
chip_gen: v6e
topology: v6e:2x2x1
jax: 0.10.0
libtpu: 0.0.40
codegen_flags: <defaults>
</compile_context>

<pallas_src>
import numpy as np
import jax
import jax.numpy as jnp
from jax import lax
from jax.experimental import pallas as pl
from jax.experimental.pallas import tpu as pltpu

_SQRT2 = float(2.0 ** 0.5)


# ----------------------------------------------------------------------------
# Filters (deterministic, defined in-script — same constants as the reference)
# ----------------------------------------------------------------------------
def dfb_filter():
    v = np.array([0.63, -0.193, 0.0972, -0.0526, 0.0272, -0.0144], dtype=np.float32)
    f = np.concatenate((v[::-1], v))
    f[::2] = -f[::2]
    return f.astype(np.float32)


def lap_filter():
    h = np.array([0.037828455506995, -0.02384946501938,
                  -0.11062440441842, 0.37740285561265], dtype=np.float32)
    h = np.concatenate((h, [0.8526986790094], h[::-1])).astype(np.float32)
    g = np.array([-0.064538882628938, -0.040689417609558,
                  0.41809227322221], dtype=np.float32)
    g = np.concatenate((g, [0.78848561640566], g[::-1])).astype(np.float32)
    return h, g


# ----------------------------------------------------------------------------
# Constant-matrix builders for the matmul formulation of the separable conv.
# All correlation-form (matches F.conv2d) and built with numpy at trace time.
# ----------------------------------------------------------------------------
def _vert_toeplitz(f, H):
    """(H, H+L-1): row-correlation applied to an already row-extended input."""
    L = len(f)
    M = np.zeros((H, H + L - 1), np.float32)
    for i in range(H):
        M[i, i:i + L] = f
    return M


def _vert_per_matrix(f, H, ru):
    """(H, H): row-correlation with the periodic row extension folded in."""
    L = len(f)
    M = np.zeros((H, H), np.float32)
    for i in range(H):
        for k in range(L):
            M[i, (i + k - ru) % H] += f[k]
    return M


def _vert_split_matrices(f, H, ru):
    """(mid, wrap) pair of (H, H): rows landing inside the image vs in the
    extension band (the latter gets the possibly column-rolled copy)."""
    L = len(f)
    mid = np.zeros((H, H), np.float32)
    wrap = np.zeros((H, H), np.float32)
    for i in range(H):
        for k in range(L):
            c = i + k
            if c < ru:
                wrap[i, H - ru + c] += f[k]
            elif c < ru + H:
                mid[i, c - ru] += f[k]
            else:
                wrap[i, c - ru - H] += f[k]
    return mid, wrap


def _horz_per_matrix(f, W, cl, tb):
    """(tb*W, tb*W) block-diag: column-correlation + periodic column wrap."""
    L = len(f)
    P = np.zeros((W, W), np.float32)
    for j in range(W):
        for k in range(L):
            P[(j + k - cl) % W, j] += f[k]
    return np.kron(np.eye(tb, dtype=np.float32), P)


def _roll_matrix(W, shift, tb):
    """(tb*W, tb*W) block-diag permutation: per-image circular left column
    shift by `shift` (identity when shift == 0)."""
    R = np.zeros((W, W), np.float32)
    for j in range(W):
        R[(j + shift) % W, j] = 1.0
    return np.kron(np.eye(tb, dtype=np.float32), R)


# ----------------------------------------------------------------------------
# Lane packing helpers: (BC, R, W) <-> (BC//tb, R, tb*W)
# ----------------------------------------------------------------------------
def _choose_tb(BC, W, max_lanes=512):
    best = 1
    for tb in range(1, BC + 1):
        if BC % tb == 0 and tb * W <= max_lanes:
            best = tb
    return best


def _pack(x, tb):
    BC, R, W = x.shape
    g = BC // tb
    return x.reshape(g, tb, R, W).transpose(0, 2, 1, 3).reshape(g, R, tb * W)


def _unpack(y, tb):
    g, R, TBW = y.shape
    W = TBW // tb
    return y.reshape(g, R, tb, W).transpose(0, 2, 1, 3).reshape(g * tb, R, W)


# ----------------------------------------------------------------------------
# Fused Laplacian-pyramid kernel:
#   xlo = sefilter2(x, h, h, 'per'); c = xlo[::2, ::2];
#   d   = x - sefilter2(dup(c), g, g, 'per')
# ----------------------------------------------------------------------------
def lpdec_layer(x):
    h, gf = lap_filter()
    N, C, H, W = x.shape
    BC = N * C

    lfh = (len(h) - 1) / 2.0
    ruh = int(np.floor(lfh))
    clh = int(np.floor(lfh))
    adjust = (len(gf) + 1) % 2
    lfg = (len(gf) - 1) / 2.0
    rug = int(np.floor(lfg) + adjust)
    clg = int(np.floor(lfg) + adjust)

    tb = _choose_tb(BC, W)
    grp = BC // tb
    TBW = tb * W

    xp = _pack(x.reshape(BC, H, W), tb)
    f1h = jnp.asarray(_vert_per_matrix(h, H, ruh))
    g2h = jnp.asarray(_horz_per_matrix(h, W, clh, tb))
    f1g = jnp.asarray(_vert_per_matrix(gf, H, rug))
    g2g = jnp.asarray(_horz_per_matrix(gf, W, clg, tb))

    def kernel(x_ref, f1h_ref, g2h_ref, f1g_ref, g2g_ref, xlo_ref, d_ref):
        xv = x_ref[0].astype(jnp.float32)                       # (H, TBW)
        xlo = jnp.dot(jnp.dot(f1h_ref[...], xv,
                              preferred_element_type=jnp.float32),
                      g2h_ref[...], preferred_element_type=jnp.float32)
        # dup(xlo[::2, ::2]) == xlo with odd rows / odd in-image cols zeroed.
        row = lax.broadcasted_iota(jnp.int32, (H, TBW), 0)
        col = lax.broadcasted_iota(jnp.int32, (H, TBW), 1)
        keep = jnp.logical_and(row % 2 == 0, (col % W) % 2 == 0)
        dz = jnp.where(keep, xlo, 0.0)
        convg = jnp.dot(jnp.dot(f1g_ref[...], dz,
                                preferred_element_type=jnp.float32),
                        g2g_ref[...], preferred_element_type=jnp.float32)
        d = xv - convg
        xlo_ref[0] = xlo.astype(xlo_ref.dtype)
        d_ref[0] = d.astype(d_ref.dtype)

    xlo_p, d_p = pl.pallas_call(
        kernel,
        out_shape=(jax.ShapeDtypeStruct((grp, H, TBW), x.dtype),
                   jax.ShapeDtypeStruct((grp, H, TBW), x.dtype)),
        grid_spec=pltpu.PrefetchScalarGridSpec(
            num_scalar_prefetch=0,
            grid=(grp,),
            in_specs=[
                pl.BlockSpec((1, H, TBW), lambda i: (i, 0, 0)),
                pl.BlockSpec((H, H), lambda i: (0, 0)),
                pl.BlockSpec((TBW, TBW), lambda i: (0, 0)),
                pl.BlockSpec((H, H), lambda i: (0, 0)),
                pl.BlockSpec((TBW, TBW), lambda i: (0, 0)),
            ],
            out_specs=(pl.BlockSpec((1, H, TBW), lambda i: (i, 0, 0)),
                       pl.BlockSpec((1, H, TBW), lambda i: (i, 0, 0))),
        ),
        compiler_params=pltpu.CompilerParams(
            dimension_semantics=("parallel",)),
    )(xp, f1h, g2h, f1g, g2g)

    xlo = _unpack(xlo_p, tb).reshape(N, C, H, W)
    d = _unpack(d_p, tb).reshape(N, C, H, W)
    c = xlo[:, :, ::2, ::2]
    return c, d


# ----------------------------------------------------------------------------
# Fused filter-bank stage kernel:
#   y0 = 1/sqrt(2) * (p0 - sefilter2(p1, f, f, extmod, [1,1]))
#   y1 = -sqrt(2) * p1 - sefilter2(y0, f, f, extmod, [0,0])
# ----------------------------------------------------------------------------
def fbdec_pair(p0, p1, f, extmod='per'):
    N, C, H, W = p0.shape
    BC = N * C
    f = np.asarray(f, np.float32)
    L = len(f)
    lf = (L - 1) / 2.0
    ruA = int(np.floor(lf) + 1)
    rdA = int(np.ceil(lf) - 1)
    clA = int(np.floor(lf) + 1)
    ruB = int(np.floor(lf))
    clB = int(np.floor(lf))
    HpA = H + ruA + rdA

    qper = (extmod == 'qper_col')
    cx2 = int(round(W / 2)) if qper else 0     # matches reference round(cx/2)

    tb = _choose_tb(BC, W)
    grp = BC // tb
    TBW = tb * W

    p0f = p0.reshape(BC, H, W)
    p1f = p1.reshape(BC, H, W)
    # Row extension of p1 for stage A ('per' or 'qper_col' — the extension rows
    # of qper_col use column-half-rolled copies).  Column wrap is folded into
    # the G2 matrices inside the kernel.
    if qper:
        p1r = jnp.concatenate([p1f[..., cx2:], p1f[..., :cx2]], axis=-1)
    else:
        p1r = p1f
    p1re = jnp.concatenate([p1r[:, H - ruA:H, :], p1f, p1r[:, :rdA, :]], axis=1)

    p0p = _pack(p0f, tb)          # (grp, H, TBW)
    p1rep = _pack(p1re, tb)       # (grp, HpA, TBW)

    f1a = jnp.asarray(_vert_toeplitz(f, H))                 # (H, HpA)
    g2a = jnp.asarray(_horz_per_matrix(f, W, clA, tb))      # (TBW, TBW)
    m_mid, m_wrap = _vert_split_matrices(f, H, ruB)
    f1bm = jnp.asarray(m_mid)                               # (H, H)
    f1bw = jnp.asarray(m_wrap)                              # (H, H)
    g2b = jnp.asarray(_horz_per_matrix(f, W, clB, tb))      # (TBW, TBW)
    rroll = jnp.asarray(_roll_matrix(W, cx2, tb))           # identity if 'per'

    s = _SQRT2
    inv_s = 1.0 / s

    def kernel(p0_ref, p1re_ref, f1a_ref, g2a_ref, f1bm_ref, f1bw_ref,
               rroll_ref, g2b_ref, y0_ref, y1_ref):
        p0v = p0_ref[0].astype(jnp.float32)                  # (H, TBW)
        p1rev = p1re_ref[0].astype(jnp.float32)              # (HpA, TBW)
        # stage A: vertical conv on the row-extended p1, then horizontal conv
        # with the periodic column wrap folded into g2a.
        acc_a = jnp.dot(f1a_ref[...], p1rev, preferred_element_type=jnp.float32)
        conv_a = jnp.dot(acc_a, g2a_ref[...], preferred_element_type=jnp.float32)
        y0 = inv_s * (p0v - conv_a)
        p1v = p1rev[ruA:ruA + H, :]                          # original p1 rows
        # stage B (in-kernel extension of y0): rows hitting the extension band
        # read the (possibly column-rolled) wrapped copy of y0.
        y0r = jnp.dot(y0, rroll_ref[...], preferred_element_type=jnp.float32)
        acc_b = (jnp.dot(f1bm_ref[...], y0, preferred_element_type=jnp.float32)
                 + jnp.dot(f1bw_ref[...], y0r, preferred_element_type=jnp.float32))
        conv_b = jnp.dot(acc_b, g2b_ref[...], preferred_element_type=jnp.float32)
        y1 = -s * p1v - conv_b
        y0_ref[0] = y0.astype(y0_ref.dtype)
        y1_ref[0] = y1.astype(y1_ref.dtype)

    y0p, y1p = pl.pallas_call(
        kernel,
        out_shape=(jax.ShapeDtypeStruct((grp, H, TBW), p0.dtype),
                   jax.ShapeDtypeStruct((grp, H, TBW), p0.dtype)),
        grid_spec=pltpu.PrefetchScalarGridSpec(
            num_scalar_prefetch=0,
            grid=(grp,),
            in_specs=[
                pl.BlockSpec((1, H, TBW), lambda i: (i, 0, 0)),
                pl.BlockSpec((1, HpA, TBW), lambda i: (i, 0, 0)),
                pl.BlockSpec((H, HpA), lambda i: (0, 0)),
                pl.BlockSpec((TBW, TBW), lambda i: (0, 0)),
                pl.BlockSpec((H, H), lambda i: (0, 0)),
                pl.BlockSpec((H, H), lambda i: (0, 0)),
                pl.BlockSpec((TBW, TBW), lambda i: (0, 0)),
                pl.BlockSpec((TBW, TBW), lambda i: (0, 0)),
            ],
            out_specs=(pl.BlockSpec((1, H, TBW), lambda i: (i, 0, 0)),
                       pl.BlockSpec((1, H, TBW), lambda i: (i, 0, 0))),
        ),
        compiler_params=pltpu.CompilerParams(
            dimension_semantics=("parallel",)),
    )(p0p, p1rep, f1a, g2a, f1bm, f1bw, rroll, g2b)

    y0 = _unpack(y0p, tb).reshape(N, C, H, W)
    y1 = _unpack(y1p, tb).reshape(N, C, H, W)
    return [y0, y1]


# ----------------------------------------------------------------------------
# Resampling (shear) operators — gather glue in plain JAX
# ----------------------------------------------------------------------------
def _resamp_index(m, n, positive, shift):
    z = np.zeros((m, n), dtype=np.int64)
    for j in range(n):
        k = (shift * j) % m if positive else (-shift * j) % m
        if k < 0:
            k += m
        rows = np.concatenate([np.arange(k, m), np.arange(k)])
        z[:, j] = rows * n + j
    return z.reshape(-1)


def resampm(x, type_, shift=1):
    N, c, m, n = x.shape
    z = _resamp_index(m, n, type_ == 1, shift)
    xf = x.reshape(N, c, m * n)
    y = xf[:, :, z]
    return y.reshape(N, c, m, n)


def resamp(x, type_, shift=1):
    if type_ in (1, 2):
        return resampm(x, type_, shift)
    elif type_ in (3, 4):
        y = jnp.swapaxes(x, 2, 3)
        y = resampm(y, type_ - 2, shift)
        return jnp.swapaxes(y, 2, 3)
    raise ValueError('type must be in {1,2,3,4}')


def new_resamp(ys, type_, shift=1):
    sample = len(ys)
    y = jnp.stack(ys)                      # (sample, N, c, m, n)
    if type_ in (3, 4):
        y = jnp.swapaxes(y, 3, 4)
    N, c, m, n = y.shape[1:]
    yf = y.reshape(sample, N, c, m * n)
    z = _resamp_index(m, n, type_ in (1, 3), shift)
    yg = yf[..., z].reshape(sample, N, c, m, n)
    if type_ in (3, 4):
        yg = jnp.swapaxes(yg, 3, 4)
    return [yg[i] for i in range(sample)]


def ppdec_layer(x, type_):
    if type_ == 1:
        p1 = jnp.concatenate([x[..., 1::2, 1:], x[..., 1::2, 0:1]], axis=3)
        p0, p1 = new_resamp([x[..., ::2, :], p1], 3)
    elif type_ == 2:
        p0, p1 = new_resamp([x[..., ::2, :], x[..., 1::2, :]], 4)
    elif type_ == 3:
        p1 = jnp.concatenate([x[..., 1:, 1::2], x[..., 0:1, 1::2]], axis=2)
        p0, p1 = new_resamp([x[..., ::2], p1], 1)
    elif type_ == 4:
        p0, p1 = new_resamp([x[..., ::2], x[..., 1::2]], 2)
    else:
        raise ValueError('Invalid argument type')
    return p0, p1


def qpdec_layer(x, type_='1r'):
    if type_ == '1r':
        y = resamp(x, 2)
        p1 = jnp.concatenate([y[..., 1::2, 1:], y[..., 1::2, 0:1]], axis=3)
        p0, p1 = new_resamp([y[..., ::2, :], p1], 3)
    elif type_ == '1c':
        y = resamp(x, 3)
        p0 = resamp(y[..., ::2], 2)
        p1 = resamp(y[..., 1::2], 2)
    elif type_ == '2r':
        y = resamp(x, 1)
        p0 = resamp(y[..., ::2, :], 4)
        p1 = resamp(y[..., 1::2, :], 4)
    elif type_ == '2c':
        y = resamp(x, 4)
        p1 = jnp.concatenate([y[..., 1:, 1::2], y[..., 0:1, 1::2]], axis=2)
        p0, p1 = new_resamp([y[..., ::2], p1], 1)
    else:
        raise ValueError('Invalid argument type')
    return p0, p1


# ----------------------------------------------------------------------------
# Filter-bank decompositions (both conv stages fused in one Pallas kernel)
# ----------------------------------------------------------------------------
def fbdec_layer(x, f, type1, type2, extmod='per'):
    if type1 == 'q':
        p0, p1 = qpdec_layer(x, type2)
    elif type1 == 'p':
        p0, p1 = ppdec_layer(x, type2)
    else:
        raise ValueError('bad type1')
    return fbdec_pair(p0, p1, f, extmod)


def new_fbdec_layer(xs, f, type1, type2, extmod='per'):
    sample = len(xs)
    x = jnp.concatenate(xs, axis=1)
    ch = x.shape[1] // sample
    if type1 == 'q':
        p0, p1 = qpdec_layer(x, type2)
    elif type1 == 'p':
        p0, p1 = ppdec_layer(x, type2)
    else:
        raise ValueError('bad type1')
    y0, y1 = fbdec_pair(p0, p1, f, extmod)
    return ([y0[:, i * ch:(i + 1) * ch] for i in range(sample)],
            [y1[:, i * ch:(i + 1) * ch] for i in range(sample)])


def backsamp(y):
    n = int(round(np.log2(len(y))))
    assert 2 ** n == len(y) and n >= 1
    if n == 1:
        for k in range(2):
            yk = resamp(y[k], 4)
            yk = yk.at[..., ::2].set(resamp(yk[..., ::2], 1))
            yk = yk.at[..., 1::2].set(resamp(yk[..., 1::2], 1))
            y[k] = yk
    if n > 2:
        N = 2 ** (n - 1)
        for k in range(1, 2 ** (n - 2) + 1):
            shift = 2 * k - (2 ** (n - 2) + 1)
            y[2 * k - 2], y[2 * k - 1] = new_resamp(
                [y[2 * k - 2], y[2 * k - 1]], 3, shift)
            y[2 * k - 2 + N], y[2 * k - 1 + N] = new_resamp(
                [y[2 * k - 2 + N], y[2 * k - 1 + N]], 1, shift)
    return y


def dfbdec_layer(x, n):
    f = dfb_filter()
    if n == 1:
        y = [None] * 2
        y[0], y[1] = fbdec_layer(x, f, 'q', '1r', 'qper_col')
    elif n >= 2:
        y = [None] * 4
        x0, x1 = fbdec_layer(x, f, 'q', '1r', 'qper_col')
        odd_list, even_list = new_fbdec_layer([x0, x1], f, 'q', '2c', 'per')
        for ix in range(len(odd_list)):
            y[ix * 2 + 1], y[ix * 2] = odd_list[ix], even_list[ix]
        for l in range(3, n + 1):
            y_old = y.copy()
            y = [None] * 2 ** l
            odd = np.arange(1, 2 ** (l - 2) + 1, 2)
            even = np.arange(2, 2 ** (l - 2) + 1, 2)
            odd_list, even_list = new_fbdec_layer(
                [y_old[k - 1] for k in odd], f, 'p', 1, 'per')
            for ix, k in enumerate(odd):
                y[2 * k - 1], y[2 * k - 2] = odd_list[ix], even_list[ix]
            odd_list, even_list = new_fbdec_layer(
                [y_old[k - 1] for k in even], f, 'p', 2, 'per')
            for ix, k in enumerate(even):
                y[2 * k - 1], y[2 * k - 2] = odd_list[ix], even_list[ix]
            odd = odd + 2 ** (l - 2)
            even = even + 2 ** (l - 2)
            odd_list, even_list = new_fbdec_layer(
                [y_old[k - 1] for k in odd], f, 'p', 3, 'per')
            for ix, k in enumerate(odd):
                y[2 * k - 1], y[2 * k - 2] = odd_list[ix], even_list[ix]
            odd_list, even_list = new_fbdec_layer(
                [y_old[k - 1] for k in even], f, 'p', 4, 'per')
            for ix, k in enumerate(even):
                y[2 * k - 1], y[2 * k - 2] = odd_list[ix], even_list[ix]
    else:
        raise ValueError('nlevs must be >= 1')
    y = backsamp(y)
    y[2 ** (n - 1):] = y[-1:2 ** (n - 1) - 1:-1]
    return y


def pdfbdec_layer(x, nlevs):
    if nlevs == 0:
        raise ValueError('nlevs must be >= 1')
    xlo, xhi = lpdec_layer(x)
    xhi = dfbdec_layer(xhi, nlevs)
    return xlo, xhi


class ContourDec:
    def __init__(self, nlevs):
        self.nlevs = nlevs
        self._fn = jax.jit(lambda x: pdfbdec_layer(x, nlevs))

    def __call__(self, x):
        return self._fn(x)


# ----------------------------------------------------------------------------
if __name__ == "__main__":
    key = jax.random.PRNGKey(0)
    x = jax.random.normal(key, (2, 4, 16, 16), dtype=jnp.float32)

    model = ContourDec(nlevs=2)
    xlo, xhi = model(x)

    xlo = jax.block_until_ready(xlo)
    for t in xhi:
        jax.block_until_ready(t)

    assert xlo.shape == (2, 4, 8, 8)
    assert len(xhi) == 4 and all(t.shape == (2, 4, 8, 8) for t in xhi)
    print("KERNEL_OK")
</pallas_src>

<mosaic_0001>
module attributes {stable_mosaic.version = 11 : i64} {
  func.func @kernel(%arg0: i32, %arg1: memref<1x16x128xf32, #tpu.memory_space<vmem>>, %arg2: memref<16x16xf32, #tpu.memory_space<vmem>>, %arg3: memref<128x128xf32, #tpu.memory_space<vmem>>, %arg4: memref<16x16xf32, #tpu.memory_space<vmem>>, %arg5: memref<128x128xf32, #tpu.memory_space<vmem>>, %arg6: memref<1x16x128xf32, #tpu.memory_space<vmem>>, %arg7: memref<1x16x128xf32, #tpu.memory_space<vmem>>) attributes {dimension_semantics = [#tpu.dimension_semantics<parallel>], iteration_bounds = array<i64: 1>, scalar_prefetch = 0 : i64, scratch_operands = 0 : i64, tpu.core_type = #tpu.core_type<tc>, window_params = [{transform_indices = @transform_0, window_bounds = array<i64: 1, 16, 128>}, {pipeline_mode = #tpu.pipeline_mode<synchronous>, transform_indices = @transform_1, window_bounds = array<i64: 16, 16>}, {pipeline_mode = #tpu.pipeline_mode<synchronous>, transform_indices = @transform_2, window_bounds = array<i64: 128, 128>}, {pipeline_mode = #tpu.pipeline_mode<synchronous>, transform_indices = @transform_3, window_bounds = array<i64: 16, 16>}, {pipeline_mode = #tpu.pipeline_mode<synchronous>, transform_indices = @transform_4, window_bounds = array<i64: 128, 128>}, {transform_indices = @transform_5, window_bounds = array<i64: 1, 16, 128>}, {transform_indices = @transform_6, window_bounds = array<i64: 1, 16, 128>}]} {
    %c0 = arith.constant 0 : index
    %c0_0 = arith.constant 0 : index
    %c0_1 = arith.constant 0 : index
    %0 = vector.load %arg1[%c0, %c0_0, %c0_1] : memref<1x16x128xf32, #tpu.memory_space<vmem>>, vector<1x16x128xf32>
    %1 = vector.shape_cast %0 : vector<1x16x128xf32> to vector<16x128xf32>
    %c0_2 = arith.constant 0 : index
    %c0_3 = arith.constant 0 : index
    %2 = vector.load %arg2[%c0_2, %c0_3] : memref<16x16xf32, #tpu.memory_space<vmem>>, vector<16x16xf32>
    %cst = arith.constant dense<0.000000e+00> : vector<16x128xf32>
    %3 = tpu.matmul %2, %1, %cst {dimension_numbers = #tpu.dot_dimension_numbers<[1], [0], [0], [1], [0, 0, 1, 1], [], []>} : vector<16x16xf32>, vector<16x128xf32>, vector<16x128xf32> -> vector<16x128xf32>
    %c0_4 = arith.constant 0 : index
    %c0_5 = arith.constant 0 : index
    %4 = vector.load %arg3[%c0_4, %c0_5] : memref<128x128xf32, #tpu.memory_space<vmem>>, vector<128x128xf32>
    %cst_6 = arith.constant dense<0.000000e+00> : vector<16x128xf32>
    %5 = tpu.matmul %3, %4, %cst_6 {dimension_numbers = #tpu.dot_dimension_numbers<[1], [0], [0], [1], [0, 0, 1, 1], [], []>} : vector<16x128xf32>, vector<128x128xf32>, vector<16x128xf32> -> vector<16x128xf32>
    %6 = tpu.iota {dimensions = array<i32: 0>} : vector<16x128xi32>
    %7 = tpu.iota {dimensions = array<i32: 1>} : vector<16x128xi32>
    %c2_i32 = arith.constant 2 : i32
    %c0_i32 = arith.constant 0 : i32
    %8 = arith.cmpi eq, %c2_i32, %c0_i32 : i32
    %c1_i32 = arith.constant 1 : i32
    %9 = arith.select %8, %c1_i32, %c2_i32 : i32
    %10 = vector.broadcast %9 : i32 to vector<16x128xi32>
    %11 = arith.remsi %6, %10 : vector<16x128xi32>
    %c0_i32_7 = arith.constant 0 : i32
    %12 = vector.broadcast %c0_i32_7 : i32 to vector<16x128xi32>
    %13 = arith.cmpi ne, %11, %12 : vector<16x128xi32>
    %c0_i32_8 = arith.constant 0 : i32
    %14 = vector.broadcast %c0_i32_8 : i32 to vector<16x128xi32>
    %15 = arith.cmpi slt, %11, %14 : vector<16x128xi32>
    %c0_i32_9 = arith.constant 0 : i32
    %16 = arith.cmpi slt, %9, %c0_i32_9 : i32
    %17 = vector.broadcast %16 : i1 to vector<16x128xi1>
    %18 = vector.broadcast %17 : vector<16x128xi1> to vector<16x128xi1>
    %19 = arith.xori %15, %18 : vector<16x128xi1>
    %20 = arith.andi %19, %13 : vector<16x128xi1>
    %21 = vector.broadcast %9 : i32 to vector<16x128xi32>
    %22 = arith.addi %11, %21 : vector<16x128xi32>
    %23 = arith.select %20, %22, %11 : vector<16x128xi1>, vector<16x128xi32>
    %c0_i32_10 = arith.constant 0 : i32
    %24 = vector.broadcast %c0_i32_10 : i32 to vector<16x128xi32>
    %25 = arith.cmpi eq, %23, %24 : vector<16x128xi32>
    %c16_i32 = arith.constant 16 : i32
    %c0_i32_11 = arith.constant 0 : i32
    %26 = arith.cmpi eq, %c16_i32, %c0_i32_11 : i32
    %c1_i32_12 = arith.constant 1 : i32
    %27 = arith.select %26, %c1_i32_12, %c16_i32 : i32
    %28 = vector.broadcast %27 : i32 to vector<16x128xi32>
    %29 = arith.remsi %7, %28 : vector<16x128xi32>
    %c0_i32_13 = arith.constant 0 : i32
    %30 = vector.broadcast %c0_i32_13 : i32 to vector<16x128xi32>
    %31 = arith.cmpi ne, %29, %30 : vector<16x128xi32>
    %c0_i32_14 = arith.constant 0 : i32
    %32 = vector.broadcast %c0_i32_14 : i32 to vector<16x128xi32>
    %33 = arith.cmpi slt, %29, %32 : vector<16x128xi32>
    %c0_i32_15 = arith.constant 0 : i32
    %34 = arith.cmpi slt, %27, %c0_i32_15 : i32
    %35 = vector.broadcast %34 : i1 to vector<16x128xi1>
    %36 = vector.broadcast %35 : vector<16x128xi1> to vector<16x128xi1>
    %37 = arith.xori %33, %36 : vector<16x128xi1>
    %38 = arith.andi %37, %31 : vector<16x128xi1>
    %39 = vector.broadcast %27 : i32 to vector<16x128xi32>
    %40 = arith.addi %29, %39 : vector<16x128xi32>
    %41 = arith.select %38, %40, %29 : vector<16x128xi1>, vector<16x128xi32>
    %c2_i32_16 = arith.constant 2 : i32
    %c0_i32_17 = arith.constant 0 : i32
    %42 = arith.cmpi eq, %c2_i32_16, %c0_i32_17 : i32
    %c1_i32_18 = arith.constant 1 : i32
    %43 = arith.select %42, %c1_i32_18, %c2_i32_16 : i32
    %44 = vector.broadcast %43 : i32 to vector<16x128xi32>
    %45 = arith.remsi %41, %44 : vector<16x128xi32>
    %c0_i32_19 = arith.constant 0 : i32
    %46 = vector.broadcast %c0_i32_19 : i32 to vector<16x128xi32>
    %47 = arith.cmpi ne, %45, %46 : vector<16x128xi32>
    %c0_i32_20 = arith.constant 0 : i32
    %48 = vector.broadcast %c0_i32_20 : i32 to vector<16x128xi32>
    %49 = arith.cmpi slt, %45, %48 : vector<16x128xi32>
    %c0_i32_21 = arith.constant 0 : i32
    %50 = arith.cmpi slt, %43, %c0_i32_21 : i32
    %51 = vector.broadcast %50 : i1 to vector<16x128xi1>
    %52 = vector.broadcast %51 : vector<16x128xi1> to vector<16x128xi1>
    %53 = arith.xori %49, %52 : vector<16x128xi1>
    %54 = arith.andi %53, %47 : vector<16x128xi1>
    %55 = vector.broadcast %43 : i32 to vector<16x128xi32>
    %56 = arith.addi %45, %55 : vector<16x128xi32>
    %57 = arith.select %54, %56, %45 : vector<16x128xi1>, vector<16x128xi32>
    %c0_i32_22 = arith.constant 0 : i32
    %58 = vector.broadcast %c0_i32_22 : i32 to vector<16x128xi32>
    %59 = arith.cmpi eq, %57, %58 : vector<16x128xi32>
    %60 = arith.andi %25, %59 : vector<16x128xi1>
    %cst_23 = arith.constant 0.000000e+00 : f32
    %61 = vector.broadcast %cst_23 : f32 to vector<16x128xf32>
    %62 = arith.select %60, %5, %61 : vector<16x128xi1>, vector<16x128xf32>
    %c0_24 = arith.constant 0 : index
    %c0_25 = arith.constant 0 : index
    %63 = vector.load %arg4[%c0_24, %c0_25] : memref<16x16xf32, #tpu.memory_space<vmem>>, vector<16x16xf32>
    %cst_26 = arith.constant dense<0.000000e+00> : vector<16x128xf32>
    %64 = tpu.matmul %63, %62, %cst_26 {dimension_numbers = #tpu.dot_dimension_numbers<[1], [0], [0], [1], [0, 0, 1, 1], [], []>} : vector<16x16xf32>, vector<16x128xf32>, vector<16x128xf32> -> vector<16x128xf32>
    %c0_27 = arith.constant 0 : index
    %c0_28 = arith.constant 0 : index
    %65 = vector.load %arg5[%c0_27, %c0_28] : memref<128x128xf32, #tpu.memory_space<vmem>>, vector<128x128xf32>
    %cst_29 = arith.constant dense<0.000000e+00> : vector<16x128xf32>
    %66 = tpu.matmul %64, %65, %cst_29 {dimension_numbers = #tpu.dot_dimension_numbers<[1], [0], [0], [1], [0, 0, 1, 1], [], []>} : vector<16x128xf32>, vector<128x128xf32>, vector<16x128xf32> -> vector<16x128xf32>
    %67 = arith.subf %1, %66 : vector<16x128xf32>
    %c0_30 = arith.constant 0 : index
    %c0_31 = arith.constant 0 : index
    %c0_32 = arith.constant 0 : index
    %68 = vector.load %arg6[%c0_30, %c0_31, %c0_32] : memref<1x16x128xf32, #tpu.memory_space<vmem>>, vector<1x16x128xf32>
    %69 = vector.shape_cast %68 : vector<1x16x128xf32> to vector<16x128xf32>
    %70 = vector.shape_cast %5 : vector<16x128xf32> to vector<1x16x128xf32>
    tpu.vector_store %arg6[%c0_30, %c0_31, %c0_32], %70 {strides = array<i32>} : memref<1x16x128xf32, #tpu.memory_space<vmem>>, vector<1x16x128xf32>,
    %c0_33 = arith.constant 0 : index
    %c0_34 = arith.constant 0 : index
    %c0_35 = arith.constant 0 : index
    %71 = vector.load %arg7[%c0_33, %c0_34, %c0_35] : memref<1x16x128xf32, #tpu.memory_space<vmem>>, vector<1x16x128xf32>
    %72 = vector.shape_cast %71 : vector<1x16x128xf32> to vector<16x128xf32>
    %73 = vector.shape_cast %67 : vector<16x128xf32> to vector<1x16x128xf32>
    tpu.vector_store %arg7[%c0_33, %c0_34, %c0_35], %73 {strides = array<i32>} : memref<1x16x128xf32, #tpu.memory_space<vmem>>, vector<1x16x128xf32>,
    return
  }
  func.func @transform_0(%arg0: i32) -> (i32, i32, i32) {
    %c0_i32 = arith.constant 0 : i32
    %c0_i32_0 = arith.constant 0 : i32
    %c0_i32_1 = arith.constant 0 : i32
    return %arg0, %c0_i32, %c0_i32_0 : i32, i32, i32
  }
  func.func @transform_1(%arg0: i32) -> (i32, i32) {
    %c0_i32 = arith.constant 0 : i32
    %c0_i32_0 = arith.constant 0 : i32
    %c0_i32_1 = arith.constant 0 : i32
    return %c0_i32, %c0_i32_0 : i32, i32
  }
  func.func @transform_2(%arg0: i32) -> (i32, i32) {
    %c0_i32 = arith.constant 0 : i32
    %c0_i32_0 = arith.constant 0 : i32
    %c0_i32_1 = arith.constant 0 : i32
    return %c0_i32, %c0_i32_0 : i32, i32
  }
  func.func @transform_3(%arg0: i32) -> (i32, i32) {
    %c0_i32 = arith.constant 0 : i32
    %c0_i32_0 = arith.constant 0 : i32
    %c0_i32_1 = arith.constant 0 : i32
    return %c0_i32, %c0_i32_0 : i32, i32
  }
  func.func @transform_4(%arg0: i32) -> (i32, i32) {
    %c0_i32 = arith.constant 0 : i32
    %c0_i32_0 = arith.constant 0 : i32
    %c0_i32_1 = arith.constant 0 : i32
    return %c0_i32, %c0_i32_0 : i32, i32
  }
  func.func @transform_5(%arg0: i32) -> (i32, i32, i32) {
    %c0_i32 = arith.constant 0 : i32
    %c0_i32_0 = arith.constant 0 : i32
    %c0_i32_1 = arith.constant 0 : i32
    return %arg0, %c0_i32, %c0_i32_0 : i32, i32, i32
  }
  func.func @transform_6(%arg0: i32) -> (i32, i32, i32) {
    %c0_i32 = arith.constant 0 : i32
    %c0_i32_0 = arith.constant 0 : i32
    %c0_i32_1 = arith.constant 0 : i32
    return %arg0, %c0_i32, %c0_i32_0 : i32, i32, i32
  }
}

module attributes {stable_mosaic.version = 11 : i64} {
  func.func @kernel(%arg0: i32, %arg1: memref<1x8x128xf32, #tpu.memory_space<vmem>>, %arg2: memref<1x19x128xf32, #tpu.memory_space<vmem>>, %arg3: memref<8x19xf32, #tpu.memory_space<vmem>>, %arg4: memref<128x128xf32, #tpu.memory_space<vmem>>, %arg5: memref<8x8xf32, #tpu.memory_space<vmem>>, %arg6: memref<8x8xf32, #tpu.memory_space<vmem>>, %arg7: memref<128x128xf32, #tpu.memory_space<vmem>>, %arg8: memref<128x128xf32, #tpu.memory_space<vmem>>, %arg9: memref<1x8x128xf32, #tpu.memory_space<vmem>>, %arg10: memref<1x8x128xf32, #tpu.memory_space<vmem>>) attributes {dimension_semantics = [#tpu.dimension_semantics<parallel>], iteration_bounds = array<i64: 1>, scalar_prefetch = 0 : i64, scratch_operands = 0 : i64, tpu.core_type = #tpu.core_type<tc>, window_params = [{transform_indices = @transform_0, window_bounds = array<i64: 1, 8, 128>}, {transform_indices = @transform_1, window_bounds = array<i64: 1, 19, 128>}, {pipeline_mode = #tpu.pipeline_mode<synchronous>, transform_indices = @transform_2, window_bounds = array<i64: 8, 19>}, {pipeline_mode = #tpu.pipeline_mode<synchronous>, transform_indices = @transform_3, window_bounds = array<i64: 128, 128>}, {pipeline_mode = #tpu.pipeline_mode<synchronous>, transform_indices = @transform_4, window_bounds = array<i64: 8, 8>}, {pipeline_mode = #tpu.pipeline_mode<synchronous>, transform_indices = @transform_5, window_bounds = array<i64: 8, 8>}, {pipeline_mode = #tpu.pipeline_mode<synchronous>, transform_indices = @transform_6, window_bounds = array<i64: 128, 128>}, {pipeline_mode = #tpu.pipeline_mode<synchronous>, transform_indices = @transform_7, window_bounds = array<i64: 128, 128>}, {transform_indices = @transform_8, window_bounds = array<i64: 1, 8, 128>}, {transform_indices = @transform_9, window_bounds = array<i64: 1, 8, 128>}]} {
    %c0 = arith.constant 0 : index
    %c0_0 = arith.constant 0 : index
    %c0_1 = arith.constant 0 : index
    %0 = vector.load %arg1[%c0, %c0_0, %c0_1] : memref<1x8x128xf32, #tpu.memory_space<vmem>>, vector<1x8x128xf32>
    %1 = vector.shape_cast %0 : vector<1x8x128xf32> to vector<8x128xf32>
    %c0_2 = arith.constant 0 : index
    %c0_3 = arith.constant 0 : index
    %c0_4 = arith.constant 0 : index
    %2 = vector.load %arg2[%c0_2, %c0_3, %c0_4] : memref<1x19x128xf32, #tpu.memory_space<vmem>>, vector<1x19x128xf32>
    %3 = vector.shape_cast %2 : vector<1x19x128xf32> to vector<19x128xf32>
    %c0_5 = arith.constant 0 : index
    %c0_6 = arith.constant 0 : index
    %4 = vector.load %arg3[%c0_5, %c0_6] : memref<8x19xf32, #tpu.memory_space<vmem>>, vector<8x19xf32>
    %cst = arith.constant dense<0.000000e+00> : vector<8x128xf32>
    %5 = tpu.matmul %4, %3, %cst {dimension_numbers = #tpu.dot_dimension_numbers<[1], [0], [0], [1], [0, 0, 1, 1], [], []>} : vector<8x19xf32>, vector<19x128xf32>, vector<8x128xf32> -> vector<8x128xf32>
    %c0_7 = arith.constant 0 : index
    %c0_8 = arith.constant 0 : index
    %6 = vector.load %arg4[%c0_7, %c0_8] : memref<128x128xf32, #tpu.memory_space<vmem>>, vector<128x128xf32>
    %cst_9 = arith.constant dense<0.000000e+00> : vector<8x128xf32>
    %7 = tpu.matmul %5, %6, %cst_9 {dimension_numbers = #tpu.dot_dimension_numbers<[1], [0], [0], [1], [0, 0, 1, 1], [], []>} : vector<8x128xf32>, vector<128x128xf32>, vector<8x128xf32> -> vector<8x128xf32>
    %8 = arith.subf %1, %7 : vector<8x128xf32>
    %cst_10 = arith.constant 0.707106769 : f32
    %9 = vector.broadcast %cst_10 : f32 to vector<8x128xf32>
    %10 = arith.mulf %9, %8 : vector<8x128xf32>
    %11 = vector.extract_strided_slice %3 {offsets = [6, 0], sizes = [8, 128], strides = [1, 1]} : vector<19x128xf32> to vector<8x128xf32>
    %c0_11 = arith.constant 0 : index
    %c0_12 = arith.constant 0 : index
    %12 = vector.load %arg7[%c0_11, %c0_12] : memref<128x128xf32, #tpu.memory_space<vmem>>, vector<128x128xf32>
    %cst_13 = arith.constant dense<0.000000e+00> : vector<8x128xf32>
    %13 = tpu.matmul %10, %12, %cst_13 {dimension_numbers = #tpu.dot_dimension_numbers<[1], [0], [0], [1], [0, 0, 1, 1], [], []>} : vector<8x128xf32>, vector<128x128xf32>, vector<8x128xf32> -> vector<8x128xf32>
    %c0_14 = arith.constant 0 : index
    %c0_15 = arith.constant 0 : index
    %14 = vector.load %arg5[%c0_14, %c0_15] : memref<8x8xf32, #tpu.memory_space<vmem>>, vector<8x8xf32>
    %cst_16 = arith.constant dense<0.000000e+00> : vector<8x128xf32>
    %15 = tpu.matmul %14, %10, %cst_16 {dimension_numbers = #tpu.dot_dimension_numbers<[1], [0], [0], [1], [0, 0, 1, 1], [], []>} : vector<8x8xf32>, vector<8x128xf32>, vector<8x128xf32> -> vector<8x128xf32>
    %c0_17 = arith.constant 0 : index
    %c0_18 = arith.constant 0 : index
    %16 = vector.load %arg6[%c0_17, %c0_18] : memref<8x8xf32, #tpu.memory_space<vmem>>, vector<8x8xf32>
    %cst_19 = arith.constant dense<0.000000e+00> : vector<8x128xf32>
    %17 = tpu.matmul %16, %13, %cst_19 {dimension_numbers = #tpu.dot_dimension_numbers<[1], [0], [0], [1], [0, 0, 1, 1], [], []>} : vector<8x8xf32>, vector<8x128xf32>, vector<8x128xf32> -> vector<8x128xf32>
    %18 = arith.addf %15, %17 : vector<8x128xf32>
    %c0_20 = arith.constant 0 : index
    %c0_21 = arith.constant 0 : index
    %19 = vector.load %arg8[%c0_20, %c0_21] : memref<128x128xf32, #tpu.memory_space<vmem>>, vector<128x128xf32>
    %cst_22 = arith.constant dense<0.000000e+00> : vector<8x128xf32>
    %20 = tpu.matmul %18, %19, %cst_22 {dimension_numbers = #tpu.dot_dimension_numbers<[1], [0], [0], [1], [0, 0, 1, 1], [], []>} : vector<8x128xf32>, vector<128x128xf32>, vector<8x128xf32> -> vector<8x128xf32>
    %cst_23 = arith.constant -1.41421354 : f32
    %21 = vector.broadcast %cst_23 : f32 to vector<8x128xf32>
    %22 = arith.mulf %21, %11 : vector<8x128xf32>
    %23 = arith.subf %22, %20 : vector<8x128xf32>
    %c0_24 = arith.constant 0 : index
    %c0_25 = arith.constant 0 : index
    %c0_26 = arith.constant 0 : index
    %24 = vector.load %arg9[%c0_24, %c0_25, %c0_26] : memref<1x8x128xf32, #tpu.memory_space<vmem>>, vector<1x8x128xf32>
    %25 = vector.shape_cast %24 : vector<1x8x128xf32> to vector<8x128xf32>
    %26 = vector.shape_cast %10 : vector<8x128xf32> to vector<1x8x128xf32>
    tpu.vector_store %arg9[%c0_24, %c0_25, %c0_26], %26 {strides = array<i32>} : memref<1x8x128xf32, #tpu.memory_space<vmem>>, vector<1x8x128xf32>,
    %c0_27 = arith.constant 0 : index
    %c0_28 = arith.constant 0 : index
    %c0_29 = arith.constant 0 : index
    %27 = vector.load %arg10[%c0_27, %c0_28, %c0_29] : memref<1x8x128xf32, #tpu.memory_space<vmem>>, vector<1x8x128xf32>
    %28 = vector.shape_cast %27 : vector<1x8x128xf32> to vector<8x128xf32>
    %29 = vector.shape_cast %23 : vector<8x128xf32> to vector<1x8x128xf32>
    tpu.vector_store %arg10[%c0_27, %c0_28, %c0_29], %29 {strides = array<i32>} : memref<1x8x128xf32, #tpu.memory_space<vmem>>, vector<1x8x128xf32>,
    return
  }
  func.func @transform_0(%arg0: i32) -> (i32, i32, i32) {
    %c0_i32 = arith.constant 0 : i32
    %c0_i32_0 = arith.constant 0 : i32
    %c0_i32_1 = arith.constant 0 : i32
    return %arg0, %c0_i32, %c0_i32_0 : i32, i32, i32
  }
  func.func @transform_1(%arg0: i32) -> (i32, i32, i32) {
    %c0_i32 = arith.constant 0 : i32
    %c0_i32_0 = arith.constant 0 : i32
    %c0_i32_1 = arith.constant 0 : i32
    return %arg0, %c0_i32, %c0_i32_0 : i32, i32, i32
  }
  func.func @transform_2(%arg0: i32) -> (i32, i32) {
    %c0_i32 = arith.constant 0 : i32
    %c0_i32_0 = arith.constant 0 : i32
    %c0_i32_1 = arith.constant 0 : i32
    return %c0_i32, %c0_i32_0 : i32, i32
  }
  func.func @transform_3(%arg0: i32) -> (i32, i32) {
    %c0_i32 = arith.constant 0 : i32
    %c0_i32_0 = arith.constant 0 : i32
    %c0_i32_1 = arith.constant 0 : i32
    return %c0_i32, %c0_i32_0 : i32, i32
  }
  func.func @transform_4(%arg0: i32) -> (i32, i32) {
    %c0_i32 = arith.constant 0 : i32
    %c0_i32_0 = arith.constant 0 : i32
    %c0_i32_1 = arith.constant 0 : i32
    return %c0_i32, %c0_i32_0 : i32, i32
  }
  func.func @transform_5(%arg0: i32) -> (i32, i32) {
    %c0_i32 = arith.constant 0 : i32
    %c0_i32_0 = arith.constant 0 : i32
    %c0_i32_1 = arith.constant 0 : i32
    return %c0_i32, %c0_i32_0 : i32, i32
  }
  func.func @transform_6(%arg0: i32) -> (i32, i32) {
    %c0_i32 = arith.constant 0 : i32
    %c0_i32_0 = arith.constant 0 : i32
    %c0_i32_1 = arith.constant 0 : i32
    return %c0_i32, %c0_i32_0 : i32, i32
  }
  func.func @transform_7(%arg0: i32) -> (i32, i32) {
    %c0_i32 = arith.constant 0 : i32
    %c0_i32_0 = arith.constant 0 : i32
    %c0_i32_1 = arith.constant 0 : i32
    return %c0_i32, %c0_i32_0 : i32, i32
  }
  func.func @transform_8(%arg0: i32) -> (i32, i32, i32) {
    %c0_i32 = arith.constant 0 : i32
    %c0_i32_0 = arith.constant 0 : i32
    %c0_i32_1 = arith.constant 0 : i32
    return %arg0, %c0_i32, %c0_i32_0 : i32, i32, i32
  }
  func.func @transform_9(%arg0: i32) -> (i32, i32, i32) {
    %c0_i32 = arith.constant 0 : i32
    %c0_i32_0 = arith.constant 0 : i32
    %c0_i32_1 = arith.constant 0 : i32
    return %arg0, %c0_i32, %c0_i32_0 : i32, i32, i32
  }
}

</mosaic_0001>

<bundles_post_ra>
// kernel: _lambda_.3
= control target key start
LH: loop header
LB: loop body
LE: loop exit
PB: predicated region body
PF: predicated region fallthrough
CT: control target
= control target key end

     0   :  { %vm26_vm0 = vcmask 130048   ;;  %v199_v23 = vlaneseq  ;;  %s756_s0 = inlined_call_operand.vmem [shape: f32[1,16,128], index: 0, kind: input, shape index: {}]   ;;  %s757_s1 = inlined_call_operand.vmem [shape: f32[16,16], index: 1, kind: input, shape index: {}]   ;;  %s758_s2 = inlined_call_operand.vmem [shape: f32[128,128], index: 2, kind: input, shape index: {}]   ;;  %s759_s3 = inlined_call_operand.vmem [shape: f32[16,16], index: 3, kind: input, shape index: {}]   ;;  %s760_s5 = inlined_call_operand.vmem [shape: f32[1,16,128], index: 5, kind: output, shape index: {0}]   ;;  %s761_s4 = inlined_call_operand.vmem [shape: f32[128,128], index: 4, kind: input, shape index: {}]   ;;  %s762_s6 = inlined_call_operand.vmem [shape: f32[1,16,128], index: 6, kind: output, shape index: {1}]  }
   0x1   :  { %v619_v0 = vld [vmem:[%s756_s0 + $0x8] sm:$0xff]  ;;  %v624_v1 = vld [vmem:[%s756_s0] sm:$0xff]  ;;  %v123_v4 = vld [vmem:[%s758_s2 + $0x78] sm:$0xff] }
   0x2   :  { %v24_v2 = vld [vmem:[%s757_s1] sm:$0xff]  ;;  %497 = vmatprep.subr.mxu1 %v619_v0  ;;  %v25_v3 = vld [vmem:[%s757_s1 + $0x8] sm:$0xff]  ;;  %v122_v5 = vld [vmem:[%s758_s2 + $0x70] sm:$0xff]  ;;  %v200_v24 = vshrl.u32 %v199_v23, 7  ;;  %v203_v25 = vand.u32 127, %v199_v23 }
   0x3   :  { %501 = vmatprep.mubr.msk.f32.mxu1 %vm26_vm0, %v24_v2  ;;  %498 = vmatpush3.msra.mxu1 %v619_v0  ;;  %v121_v6 = vld [vmem:[%s758_s2 + $0x68] sm:$0xff]  ;;  %v120_v7 = vld [vmem:[%s758_s2 + $0x60] sm:$0xff]  ;;  %v119_v8 = vld [vmem:[%s758_s2 + $0x58] sm:$0xff] }
   0x4   :  { %499 = vmatprep.subr.mxu1 %v624_v1  ;;  %v118_v9 = vld [vmem:[%s758_s2 + $0x50] sm:$0xff]  ;;  %v117_v10 = vld [vmem:[%s758_s2 + $0x48] sm:$0xff]  ;;  %v116_v11 = vld [vmem:[%s758_s2 + $0x40] sm:$0xff]  ;;  %v201_v26 = vadd.s32 8, %v200_v24  ;;  %v234_v27 = vand.u32 15, %v203_v25  ;;  %v208_v30 = vand.u32 1, %v200_v24 }
   0x5   :  { %500 = vmatpush3.msra.mxu1 %v624_v1  ;;  %v115_v12 = vld [vmem:[%s758_s2 + $0x38] sm:$0xff]  ;;  %v114_v13 = vld [vmem:[%s758_s2 + $0x30] sm:$0xff]  ;;  %v113_v14 = vld [vmem:[%s758_s2 + $0x28] sm:$0xff] }
   0x6   :  { %502 = vmatmul.mubr.msk.f32.vlgmr.msra.gmra.mxu1 %vm26_vm0, %v25_v3  ;;  %504 = vmatprep.subr.mxu1 %v123_v4  ;;  %v112_v15 = vld [vmem:[%s758_s2 + $0x20] sm:$0xff]  ;;  %v111_v16 = vld [vmem:[%s758_s2 + $0x18] sm:$0xff]  ;;  %v110_v17 = vld [vmem:[%s758_s2 + $0x10] sm:$0xff]  ;;  %v215_v28 = vand.u32 1, %v201_v26  ;;  %v246_v29 = vand.u32 1, %v234_v27  ;;  %vm228_vm3 = vcmp.eq.s32.totalorder %v208_v30, 0 }
   0x7   :  { %505 = vmatpush3.msra.mxu1 %v123_v4  ;;  %v109_v18 = vld [vmem:[%s758_s2 + $0x8] sm:$0xff]  ;;  %v108_v19 = vld [vmem:[%s758_s2] sm:$0xff]  ;;  %v357_v34 = vld [vmem:[%s761_s4 + $0x78] sm:$0xff] }
   0x8   :  { %506 = vmatprep.subr.mxu1 %v122_v5  ;;  %v259_v22 = vld [vmem:[%s759_s3] sm:$0xff]  ;;  %vm229_vm1 = vcmp.eq.s32.totalorder %v215_v28, 0  ;;  %vm254_vm2 = vcmp.eq.s32.totalorder %v246_v29, 0  ;;  %v260_v33 = vld [vmem:[%s759_s3 + $0x8] sm:$0xff]  ;;  %v356_v35 = vld [vmem:[%s761_s4 + $0x70] sm:$0xff] }
   0x9   :  { %507 = vmatpush3.msra.mxu1 %v122_v5  ;;  %543 = vmatprep.mubr.msk.f32.mxu0 %vm26_vm0, %v259_v22  ;;  %vm256_vm4 = vmand %vm229_vm1, %vm254_vm2  ;;  %v355_v36 = vld [vmem:[%s761_s4 + $0x68] sm:$0xff]  ;;  %v354_v37 = vld [vmem:[%s761_s4 + $0x60] sm:$0xff] }
   0xa   :  { %508 = vmatprep.subr.mxu1 %v121_v6  ;;  %vm255_vm5 = vmand %vm228_vm3, %vm254_vm2  ;;  %v353_v38 = vld [vmem:[%s761_s4 + $0x58] sm:$0xff]  ;;  %v352_v39 = vld [vmem:[%s761_s4 + $0x50] sm:$0xff] }
   0xb   :  { %509 = vmatpush3.msra.mxu1 %v121_v6  ;;  %v351_v40 = vld [vmem:[%s761_s4 + $0x48] sm:$0xff]  ;;  %v350_v41 = vld [vmem:[%s761_s4 + $0x40] sm:$0xff]  ;;  %v349_v42 = vld [vmem:[%s761_s4 + $0x38] sm:$0xff] }
   0xc   :  { %510 = vmatprep.subr.mxu1 %v120_v7  ;;  %v348_v43 = vld [vmem:[%s761_s4 + $0x30] sm:$0xff]  ;;  %v347_v44 = vld [vmem:[%s761_s4 + $0x28] sm:$0xff]  ;;  %v346_v45 = vld [vmem:[%s761_s4 + $0x20] sm:$0xff] }
   0xd   :  { %511 = vmatpush3.msra.mxu1 %v120_v7  ;;  %v345_v46 = vld [vmem:[%s761_s4 + $0x18] sm:$0xff]  ;;  %v344_v47 = vld [vmem:[%s761_s4 + $0x10] sm:$0xff]  ;;  %v343_v48 = vld [vmem:[%s761_s4 + $0x8] sm:$0xff] }
   0xe   :  { %512 = vmatprep.subr.mxu1 %v119_v8  ;;  %v342_v49 = vld [vmem:[%s761_s4] sm:$0xff] }
   0xf   :  { %513 = vmatpush3.msra.mxu1 %v119_v8 }
  0x10   :  { %514 = vmatprep.subr.mxu1 %v118_v9 }
  0x11   :  { %515 = vmatpush3.msra.mxu1 %v118_v9 }
  0x12   :  { %516 = vmatprep.subr.mxu1 %v117_v10 }
  0x13   :  { %517 = vmatpush3.msra.mxu1 %v117_v10 }
  0x14   :  { %518 = vmatprep.subr.mxu1 %v116_v11 }
  0x15   :  { %519 = vmatpush3.msra.mxu1 %v116_v11 }
  0x16   :  { %520 = vmatprep.subr.mxu1 %v115_v12 }
  0x17   :  { %521 = vmatpush3.msra.mxu1 %v115_v12 }
  0x18   :  { %522 = vmatprep.subr.mxu1 %v114_v13 }
  0x19   :  { %523 = vmatpush3.msra.mxu1 %v114_v13 }
  0x1a   :  { %524 = vmatprep.subr.mxu1 %v113_v14 }
  0x1b   :  { %525 = vmatpush3.msra.mxu1 %v113_v14 }
  0x1c   :  { %526 = vmatprep.subr.mxu1 %v112_v15 }
  0x1d   :  { %527 = vmatpush3.msra.mxu1 %v112_v15 }
  0x1e   :  { %528 = vmatprep.subr.mxu1 %v111_v16 }
  0x1f   :  { %529 = vmatpush3.msra.mxu1 %v111_v16 }
  0x20   :  { %530 = vmatprep.subr.mxu1 %v110_v17 }
  0x21   :  { %531 = vmatpush3.msra.mxu1 %v110_v17 }
  0x22   :  { %532 = vmatprep.subr.mxu1 %v109_v18 }
  0x23   :  { %533 = vmatpush3.msra.mxu1 %v109_v18 }
  0x24   :  { %534 = vmatprep.subr.mxu1 %v108_v19 }
  0x25   :  { %535 = vmatpush3.msra.mxu1 %v108_v19 }
  0xc6   :  { %v503_v20 = vpop.f32.mrf.mxu1 }
  0xc8   :  { %v99_v21 = vpop.f32.mrf.mxu1 }
  0xc9   :  { %536 = vmatprep.mubr.f32.mxu1 %v99_v21 }
  0xca   :  { %537 = vmatmul.mubr.f32.vlgmr.msra.gmra.mxu1 %v503_v20 }
 0x18a   :  { %v538_v31 = vpop.f32.mrf.mxu1 }
 0x18b   :  { %539 = vmatprep.subr.msk.mxu0 %vm256_vm4, %v538_v31  ;;  %436 = vst [vmem:[%s760_s5 + $0x8] sm:$0xff] %v538_v31 }
 0x18c   :  { %v190_v32 = vpop.f32.mrf.mxu1  ;;  %540 = vmatpush3.msk.msra.mxu0 %vm256_vm4, %v538_v31 }
 0x18d   :  { %435 = vst [vmem:[%s760_s5] sm:$0xff] %v190_v32  ;;  %541 = vmatprep.subr.msk.mxu0 %vm255_vm5, %v190_v32 }
 0x18e   :  { %542 = vmatpush3.msk.msra.mxu0 %vm255_vm5, %v190_v32 }
 0x18f   :  { %544 = vmatmul.mubr.msk.f32.vlgmr.msra.gmra.mxu0 %vm26_vm0, %v260_v33  ;;  %546 = vmatprep.subr.mxu0 %v357_v34 }
 0x190   :  { %547 = vmatpush3.msra.mxu0 %v357_v34 }
 0x191   :  { %548 = vmatprep.subr.mxu0 %v356_v35 }
 0x192   :  { %549 = vmatpush3.msra.mxu0 %v356_v35 }
 0x193   :  { %550 = vmatprep.subr.mxu0 %v355_v36 }
 0x194   :  { %551 = vmatpush3.msra.mxu0 %v355_v36 }
 0x195   :  { %552 = vmatprep.subr.mxu0 %v354_v37 }
 0x196   :  { %553 = vmatpush3.msra.mxu0 %v354_v37 }
 0x197   :  { %554 = vmatprep.subr.mxu0 %v353_v38 }
 0x198   :  { %555 = vmatpush3.msra.mxu0 %v353_v38 }
 0x199   :  { %556 = vmatprep.subr.mxu0 %v352_v39 }
 0x19a   :  { %557 = vmatpush3.msra.mxu0 %v352_v39 }
 0x19b   :  { %558 = vmatprep.subr.mxu0 %v351_v40 }
 0x19c   :  { %559 = vmatpush3.msra.mxu0 %v351_v40 }
 0x19d   :  { %560 = vmatprep.subr.mxu0 %v350_v41 }
 0x19e   :  { %561 = vmatpush3.msra.mxu0 %v350_v41 }
 0x19f   :  { %562 = vmatprep.subr.mxu0 %v349_v42 }
 0x1a0   :  { %563 = vmatpush3.msra.mxu0 %v349_v42 }
 0x1a1   :  { %564 = vmatprep.subr.mxu0 %v348_v43 }
 0x1a2   :  { %565 = vmatpush3.msra.mxu0 %v348_v43 }
 0x1a3   :  { %566 = vmatprep.subr.mxu0 %v347_v44 }
 0x1a4   :  { %567 = vmatpush3.msra.mxu0 %v347_v44 }
 0x1a5   :  { %568 = vmatprep.subr.mxu0 %v346_v45 }
 0x1a6   :  { %569 = vmatpush3.msra.mxu0 %v346_v45 }
 0x1a7   :  { %570 = vmatprep.subr.mxu0 %v345_v46 }
 0x1a8   :  { %571 = vmatpush3.msra.mxu0 %v345_v46 }
 0x1a9   :  { %572 = vmatprep.subr.mxu0 %v344_v47 }
 0x1aa   :  { %573 = vmatpush3.msra.mxu0 %v344_v47 }
 0x1ab   :  { %574 = vmatprep.subr.mxu0 %v343_v48 }
 0x1ac   :  { %575 = vmatpush3.msra.mxu0 %v343_v48 }
 0x1ad   :  { %576 = vmatprep.subr.mxu0 %v342_v49 }
 0x1ae   :  { %577 = vmatpush3.msra.mxu0 %v342_v49 }
 0x24f   :  { %v545_v50 = vpop.f32.mrf.mxu0 }
 0x251   :  { %v333_v51 = vpop.f32.mrf.mxu0 }
 0x252   :  { %578 = vmatprep.mubr.f32.mxu0 %v333_v51 }
 0x253   :  { %579 = vmatmul.mubr.f32.vlgmr.msra.gmra.mxu0 %v545_v50 }
 0x313   :  { %v580_v52 = vpop.f32.mrf.mxu0 }
 0x314   :  { %v434_v53 = vsub.f32 %v619_v0, %v580_v52 }
 0x315   :  { %v424_v54 = vpop.f32.mrf.mxu0 }
 0x316   :  { %438 = vst [vmem:[%s762_s6 + $0x8] sm:$0xff] %v434_v53  ;;  %v433_v55 = vsub.f32 %v624_v1, %v424_v54 }
 0x318   :  { %437 = vst [vmem:[%s762_s6] sm:$0xff] %v433_v55 }

// kernel: _lambda_.4
= control target key start
LH: loop header
LB: loop body
LE: loop exit
PB: predicated region body
PF: predicated region fallthrough
CT: control target
= control target key end

     0   :  { %vm40_vm0 = vcmask 1042432   ;;  %v730_v0 = vmov 0.0   ;;  %vm731_vm1 = vmmov 0   ;;  %vm36_vm2 = vcmask 154624   ;;  %s1029_s1 = inlined_call_operand.vmem [shape: f32[1,19,128], index: 1, kind: input, shape index: {}]   ;;  %s1030_s2 = inlined_call_operand.vmem [shape: f32[8,19], index: 2, kind: input, shape index: {}]   ;;  %s1031_s3 = inlined_call_operand.vmem [shape: f32[128,128], index: 3, kind: input, shape index: {}]   ;;  %s1032_s6 = inlined_call_operand.vmem [shape: f32[128,128], index: 6, kind: input, shape index: {}]   ;;  %s1033_s0 = inlined_call_operand.vmem [shape: f32[1,8,128], index: 0, kind: input, shape index: {}]   ;;  %s1034_s8 = inlined_call_operand.vmem [shape: f32[1,8,128], index: 8, kind: output, shape index: {0}]   ;;  %s1035_s7 = inlined_call_operand.vmem [shape: f32[128,128], index: 7, kind: input, shape index: {}]   ;;  %s1036_s5 = inlined_call_operand.vmem [shape: f32[8,8], index: 5, kind: input, shape index: {}]   ;;  %s1037_s4 = inlined_call_operand.vmem [shape: f32[8,8], index: 4, kind: input, shape index: {}]   ;;  %s1038_s9 = inlined_call_operand.vmem [shape: f32[1,8,128], index: 9, kind: output, shape index: {1}]  }
   0x1   :  { %604 = vmatprep.subr.mxu1 %v730_v0  ;;  %v34_v1 = vld [vmem:[%s1029_s1 + $0x10] sm:$0x7]  ;;  %v789_v2 = vld [vmem:[%s1029_s1 + $0x8] sm:$0xff]  ;;  %610 = vmatprep.mubr.msk.f32.mxu1 %vm731_vm1, %v730_v0  ;;  %v798_v3 = vld [vmem:[%s1029_s1] sm:$0xff]  ;;  %vm290_vm3 = vcmask 64512  }
   0x2   :  { %605 = vmatpush3.msk.msra.mxu1 %vm40_vm0, %v34_v1  ;;  %648 = vmatprep.subr.mxu0 %v730_v0  ;;  %v35_v4 = vld [vmem:[%s1030_s2] sm:$0xff]  ;;  %v129_v5 = vld [vmem:[%s1031_s3 + $0x78] sm:$0xff]  ;;  %v128_v6 = vld [vmem:[%s1031_s3 + $0x70] sm:$0xff] }
   0x3   :  { %606 = vmatprep.subr.mxu1 %v730_v0  ;;  %680 = vmatprep.mubr.msk.f32.mxu0 %vm731_vm1, %v730_v0  ;;  %v127_v7 = vld [vmem:[%s1031_s3 + $0x68] sm:$0xff]  ;;  %v126_v8 = vld [vmem:[%s1031_s3 + $0x60] sm:$0xff]  ;;  %v125_v9 = vld [vmem:[%s1031_s3 + $0x58] sm:$0xff] }
   0x4   :  { %607 = vmatpush3.msra.mxu1 %v789_v2  ;;  %v124_v10 = vld [vmem:[%s1031_s3 + $0x50] sm:$0xff]  ;;  %v123_v11 = vld [vmem:[%s1031_s3 + $0x48] sm:$0xff]  ;;  %v122_v12 = vld [vmem:[%s1031_s3 + $0x40] sm:$0xff] }
   0x5   :  { %608 = vmatprep.subr.mxu1 %v730_v0  ;;  %v121_v13 = vld [vmem:[%s1031_s3 + $0x38] sm:$0xff]  ;;  %v120_v14 = vld [vmem:[%s1031_s3 + $0x30] sm:$0xff]  ;;  %v119_v15 = vld [vmem:[%s1031_s3 + $0x28] sm:$0xff] }
   0x6   :  { %609 = vmatpush3.msra.mxu1 %v798_v3  ;;  %v118_v16 = vld [vmem:[%s1031_s3 + $0x20] sm:$0xff]  ;;  %v117_v17 = vld [vmem:[%s1031_s3 + $0x18] sm:$0xff]  ;;  %v116_v18 = vld [vmem:[%s1031_s3 + $0x10] sm:$0xff] }
   0x7   :  { %611 = vmatmul.mubr.msk.f32.vlgmr.msra.gmra.mxu1 %vm36_vm2, %v35_v4  ;;  %613 = vmatprep.subr.mxu1 %v730_v0  ;;  %v115_v19 = vld [vmem:[%s1031_s3 + $0x8] sm:$0xff]  ;;  %v114_v20 = vld [vmem:[%s1031_s3] sm:$0xff]  ;;  %v217_v21 = vld [vmem:[%s1032_s6 + $0x78] sm:$0xff] }
   0x8   :  { %614 = vmatpush3.msra.mxu1 %v129_v5  ;;  %645 = vmatprep.mubr.msk.f32.mxu1 %vm731_vm1, %v730_v0  ;;  %v216_v22 = vld [vmem:[%s1032_s6 + $0x70] sm:$0xff]  ;;  %v215_v23 = vld [vmem:[%s1032_s6 + $0x68] sm:$0xff]  ;;  %v214_v24 = vld [vmem:[%s1032_s6 + $0x60] sm:$0xff] }
   0x9   :  { %615 = vmatprep.subr.mxu1 %v730_v0  ;;  %649 = vmatpush3.msra.mxu0 %v217_v21  ;;  %v213_v25 = vld [vmem:[%s1032_s6 + $0x58] sm:$0xff]  ;;  %v212_v26 = vld [vmem:[%s1032_s6 + $0x50] sm:$0xff]  ;;  %v211_v27 = vld [vmem:[%s1032_s6 + $0x48] sm:$0xff] }
   0xa   :  { %616 = vmatpush3.msra.mxu1 %v128_v6  ;;  %650 = vmatprep.subr.mxu0 %v730_v0  ;;  %v210_v28 = vld [vmem:[%s1032_s6 + $0x40] sm:$0xff]  ;;  %v209_v29 = vld [vmem:[%s1032_s6 + $0x38] sm:$0xff]  ;;  %v208_v30 = vld [vmem:[%s1032_s6 + $0x30] sm:$0xff] }
   0xb   :  { %617 = vmatprep.subr.mxu1 %v730_v0  ;;  %651 = vmatpush3.msra.mxu0 %v216_v22  ;;  %v207_v31 = vld [vmem:[%s1032_s6 + $0x28] sm:$0xff]  ;;  %v206_v32 = vld [vmem:[%s1032_s6 + $0x20] sm:$0xff]  ;;  %v205_v33 = vld [vmem:[%s1032_s6 + $0x18] sm:$0xff] }
   0xc   :  { %618 = vmatpush3.msra.mxu1 %v127_v7  ;;  %652 = vmatprep.subr.mxu0 %v730_v0  ;;  %v204_v36 = vld [vmem:[%s1032_s6 + $0x10] sm:$0xff]  ;;  %v203_v37 = vld [vmem:[%s1032_s6 + $0x8] sm:$0xff]  ;;  %v202_v38 = vld [vmem:[%s1032_s6] sm:$0xff] }
   0xd   :  { %619 = vmatprep.subr.mxu1 %v730_v0  ;;  %653 = vmatpush3.msra.mxu0 %v215_v23  ;;  %v31_v39 = vld [vmem:[%s1033_s0] sm:$0xff]  ;;  %v452_v44 = vld [vmem:[%s1035_s7 + $0x78] sm:$0xff]  ;;  %v451_v45 = vld [vmem:[%s1035_s7 + $0x70] sm:$0xff] }
   0xe   :  { %620 = vmatpush3.msra.mxu1 %v126_v8  ;;  %654 = vmatprep.subr.mxu0 %v730_v0  ;;  %v450_v46 = vld [vmem:[%s1035_s7 + $0x68] sm:$0xff]  ;;  %v449_v47 = vld [vmem:[%s1035_s7 + $0x60] sm:$0xff]  ;;  %v448_v48 = vld [vmem:[%s1035_s7 + $0x58] sm:$0xff]  ;;  %v524_v8 = vmul.f32 -1.4142135, %v789_v2 }
   0xf   :  { %621 = vmatprep.subr.mxu1 %v730_v0  ;;  %655 = vmatpush3.msra.mxu0 %v214_v24  ;;  %v447_v49 = vld [vmem:[%s1035_s7 + $0x50] sm:$0xff]  ;;  %v446_v50 = vld [vmem:[%s1035_s7 + $0x48] sm:$0xff]  ;;  %v445_v51 = vld [vmem:[%s1035_s7 + $0x40] sm:$0xff] }
  0x10   :  { %622 = vmatpush3.msra.mxu1 %v125_v9  ;;  %656 = vmatprep.subr.mxu0 %v730_v0  ;;  %v444_v52 = vld [vmem:[%s1035_s7 + $0x38] sm:$0xff]  ;;  %v443_v53 = vld [vmem:[%s1035_s7 + $0x30] sm:$0xff]  ;;  %v442_v54 = vld [vmem:[%s1035_s7 + $0x28] sm:$0xff]  ;;  %v523_v9 = vmul.f32 -1.4142135, %v798_v3 }
  0x11   :  { %623 = vmatprep.subr.mxu1 %v730_v0  ;;  %657 = vmatpush3.msra.mxu0 %v213_v25  ;;  %v441_v55 = vld [vmem:[%s1035_s7 + $0x20] sm:$0xff]  ;;  %v440_v60 = vld [vmem:[%s1035_s7 + $0x18] sm:$0xff]  ;;  %v439_v61 = vld [vmem:[%s1035_s7 + $0x10] sm:$0xff] }
  0x12   :  { %624 = vmatpush3.msra.mxu1 %v124_v10  ;;  %658 = vmatprep.subr.mxu0 %v730_v0  ;;  %v289_v56 = vld [vmem:[%s1036_s5] sm:$0xff]  ;;  %v438_v62 = vld [vmem:[%s1035_s7 + $0x8] sm:$0xff] }
  0x13   :  { %625 = vmatprep.subr.mxu1 %v730_v0  ;;  %659 = vmatpush3.msra.mxu0 %v212_v26  ;;  %v288_v59 = vld [vmem:[%s1037_s4] sm:$0xff] }
  0x14   :  { %626 = vmatpush3.msra.mxu1 %v123_v11  ;;  %660 = vmatprep.subr.mxu0 %v730_v0  ;;  %v437_v63 = vld [vmem:[%s1035_s7] sm:$0xff] }
  0x15   :  { %627 = vmatprep.subr.mxu1 %v730_v0  ;;  %661 = vmatpush3.msra.mxu0 %v211_v27 }
  0x16   :  { %628 = vmatpush3.msra.mxu1 %v122_v12  ;;  %662 = vmatprep.subr.mxu0 %v730_v0 }
  0x17   :  { %629 = vmatprep.subr.mxu1 %v730_v0  ;;  %663 = vmatpush3.msra.mxu0 %v210_v28 }
  0x18   :  { %630 = vmatpush3.msra.mxu1 %v121_v13  ;;  %664 = vmatprep.subr.mxu0 %v730_v0 }
  0x19   :  { %631 = vmatprep.subr.mxu1 %v730_v0  ;;  %665 = vmatpush3.msra.mxu0 %v209_v29 }
  0x1a   :  { %632 = vmatpush3.msra.mxu1 %v120_v14  ;;  %666 = vmatprep.subr.mxu0 %v730_v0 }
  0x1b   :  { %633 = vmatprep.subr.mxu1 %v730_v0  ;;  %667 = vmatpush3.msra.mxu0 %v208_v30 }
  0x1c   :  { %634 = vmatpush3.msra.mxu1 %v119_v15  ;;  %668 = vmatprep.subr.mxu0 %v730_v0 }
  0x1d   :  { %635 = vmatprep.subr.mxu1 %v730_v0  ;;  %669 = vmatpush3.msra.mxu0 %v207_v31 }
  0x1e   :  { %636 = vmatpush3.msra.mxu1 %v118_v16  ;;  %670 = vmatprep.subr.mxu0 %v730_v0 }
  0x1f   :  { %637 = vmatprep.subr.mxu1 %v730_v0  ;;  %671 = vmatpush3.msra.mxu0 %v206_v32 }
  0x20   :  { %638 = vmatpush3.msra.mxu1 %v117_v17  ;;  %672 = vmatprep.subr.mxu0 %v730_v0 }
  0x21   :  { %639 = vmatprep.subr.mxu1 %v730_v0  ;;  %673 = vmatpush3.msra.mxu0 %v205_v33 }
  0x22   :  { %640 = vmatpush3.msra.mxu1 %v116_v18  ;;  %674 = vmatprep.subr.mxu0 %v730_v0 }
  0x23   :  { %641 = vmatprep.subr.mxu1 %v730_v0  ;;  %675 = vmatpush3.msra.mxu0 %v204_v36 }
  0x24   :  { %642 = vmatpush3.msra.mxu1 %v115_v19  ;;  %676 = vmatprep.subr.mxu0 %v730_v0 }
  0x25   :  { %643 = vmatprep.subr.mxu1 %v730_v0  ;;  %677 = vmatpush3.msra.mxu0 %v203_v37 }
  0x26   :  { %644 = vmatpush3.msra.mxu1 %v114_v20  ;;  %678 = vmatprep.subr.mxu0 %v730_v0 }
  0x27   :  { %683 = vmatprep.subr.mxu1 %v730_v0  ;;  %679 = vmatpush3.msra.mxu0 %v202_v38 }
  0x28   :  { %693 = vmatprep.subr.mxu0 %v730_v0 }
  0xc7   :  { %v110_v34 = vpop.f32.mrf.mxu1 }
  0xc8   :  { %646 = vmatmul.mubr.f32.vlgmr.msra.gmra.mxu1 %v110_v34 }
  0xc9   :  { %v612_v35 = vpop.f32.mrf.mxu1  ;;  %685 = vmatprep.mubr.msk.f32.mxu1 %vm731_vm1, %v730_v0 }
 0x188   :  { %v196_v40 = vpop.f32.mrf.mxu1 }
 0x189   :  { %v200_v41 = vsub.f32 %v31_v39, %v196_v40 }
 0x18a   :  { %v647_v42 = vpop.f32.mrf.mxu1 }
 0x18b   :  { %v201_v43 = vmul.f32 0.70710677, %v200_v41 }
 0x18d   :  { %530 = vst [vmem:[%s1034_s8] sm:$0xff] %v201_v43  ;;  %681 = vmatmul.mubr.f32.vlgmr.msra.gmra.mxu0 %v201_v43 }
 0x18e   :  { %725 = vmatprep.mubr.msk.f32.mxu0 %vm731_vm1, %v730_v0  ;;  %694 = vmatpush3.msra.mxu0 %v452_v44 }
 0x18f   :  { %695 = vmatprep.subr.mxu0 %v730_v0 }
 0x190   :  { %696 = vmatpush3.msra.mxu0 %v451_v45 }
 0x191   :  { %697 = vmatprep.subr.mxu0 %v730_v0 }
 0x192   :  { %698 = vmatpush3.msra.mxu0 %v450_v46 }
 0x193   :  { %699 = vmatprep.subr.mxu0 %v730_v0 }
 0x194   :  { %700 = vmatpush3.msra.mxu0 %v449_v47 }
 0x195   :  { %701 = vmatprep.subr.mxu0 %v730_v0 }
 0x196   :  { %702 = vmatpush3.msra.mxu0 %v448_v48 }
 0x197   :  { %703 = vmatprep.subr.mxu0 %v730_v0 }
 0x198   :  { %704 = vmatpush3.msra.mxu0 %v447_v49 }
 0x199   :  { %705 = vmatprep.subr.mxu0 %v730_v0 }
 0x19a   :  { %706 = vmatpush3.msra.mxu0 %v446_v50 }
 0x19b   :  { %707 = vmatprep.subr.mxu0 %v730_v0 }
 0x19c   :  { %708 = vmatpush3.msra.mxu0 %v445_v51 }
 0x19d   :  { %709 = vmatprep.subr.mxu0 %v730_v0 }
 0x19e   :  { %710 = vmatpush3.msra.mxu0 %v444_v52 }
 0x19f   :  { %711 = vmatprep.subr.mxu0 %v730_v0 }
 0x1a0   :  { %712 = vmatpush3.msra.mxu0 %v443_v53 }
 0x1a1   :  { %713 = vmatprep.subr.mxu0 %v730_v0 }
 0x1a2   :  { %714 = vmatpush3.msra.mxu0 %v442_v54 }
 0x1a3   :  { %715 = vmatprep.subr.mxu0 %v730_v0 }
 0x1a4   :  { %716 = vmatpush3.msra.mxu0 %v441_v55 }
 0x1a5   :  { %717 = vmatprep.subr.mxu0 %v730_v0 }
 0x1a6   :  { %718 = vmatpush3.msra.mxu0 %v440_v60 }
 0x1a7   :  { %719 = vmatprep.subr.mxu0 %v730_v0 }
 0x1a8   :  { %720 = vmatpush3.msra.mxu0 %v439_v61 }
 0x1a9   :  { %721 = vmatprep.subr.mxu0 %v730_v0 }
 0x1aa   :  { %722 = vmatpush3.msra.mxu0 %v438_v62 }
 0x1ab   :  { %723 = vmatprep.subr.mxu0 %v730_v0 }
 0x1ac   :  { %724 = vmatpush3.msra.mxu0 %v437_v63 }
 0x24d   :  { %v284_v57 = vpop.f32.mrf.mxu0 }
 0x24e   :  { %684 = vmatpush3.msra.mxu1 %v284_v57 }
 0x24f   :  { %v682_v58 = vpop.f32.mrf.mxu0  ;;  %686 = vmatmul.mubr.msk.f32.vlgmr.msra.gmra.mxu1 %vm290_vm3, %v289_v56  ;;  %688 = vmatprep.subr.mxu1 %v730_v0 }
 0x250   :  { %689 = vmatpush3.msra.mxu1 %v201_v43  ;;  %690 = vmatprep.mubr.msk.f32.mxu1 %vm731_vm1, %v730_v0 }
 0x253   :  { %691 = vmatmul.mubr.msk.f32.vlgmr.msra.gmra.mxu1 %vm290_vm3, %v288_v59 }
 0x30f   :  { %v360_v1 = vpop.f32.mrf.mxu1 }
 0x311   :  { %v687_v4 = vpop.f32.mrf.mxu1 }
 0x313   :  { %v433_v5 = vpop.f32.mrf.mxu1 }
 0x314   :  { %v434_v6 = vadd.f32 %v433_v5, %v360_v1 }
 0x315   :  { %v692_v7 = vpop.f32.mrf.mxu1 }
 0x316   :  { %726 = vmatmul.mubr.f32.vlgmr.msra.gmra.mxu0 %v434_v6 }
 0x3d6   :  { %v519_v10 = vpop.f32.mrf.mxu0 }
 0x3d7   :  { %v526_v11 = vrot.slane %v519_v10, 2 }
 0x3d8   :  { %v727_v12 = vpop.f32.mrf.mxu0 }
 0x3d9   :  { %v528_v13 = vsub.f32 %v523_v9, %v526_v11  ;;  %v529_v0 = vsub.f32 %v524_v8, %v526_v11 }
 0x3db   :  { %531 = vst [vmem:[%s1038_s9 - $0x6] sm:$0xc0] %v528_v13  ;;  %532 = vst [vmem:[%s1038_s9 + $0x2] sm:$0x3f] %v529_v0 }

// kernel: squeeze.7
= control target key start
LH: loop header
LB: loop body
LE: loop exit
PB: predicated region body
PF: predicated region fallthrough
CT: control target
= control target key end

     0   :  { %vm3_vm0 = vcmask 64512   ;;  %s178_s10 = smov 120   ;;  %s179_s19 = smov 104   ;;  %s328_s0 = inlined_call_operand.vmem [shape: f32[1,2,8,64], index: 0, kind: input, shape index: {}]   ;;  %s329_s1 = inlined_call_operand.vmem [shape: f32[1,16,8,8], index: 1, kind: output, shape index: {}]  }
   0x1   :  { %v30_v0 = vld [vmem:[%s328_s0] sm:$0xff]   ;;  %v142_v1 = vld [vmem:[%s328_s0 + $0x8] sm:$0xff]   ;;  %s177_s0 = smov 112   ;;  %s180_s20 = smov 96  }
   0x2   :  { %31 = vrot.lane.b32.xlu1 %v30_v0, %s177_s0  ;;  %14 = vrot.lane.b32.xlu0 %v30_v0, %s178_s10  ;;  %4 = vst.msk [vmem:[%s329_s1] ss:$8 sm:$0xf] %vm3_vm0, %v30_v0   ;;  %5 = vst.msk [vmem:[%s329_s1] ss:$8 sm:$0xf0] %vm3_vm0, %v30_v0  }
   0x3   :  { %133 = vst.msk [vmem:[%s329_s1 + $0x40] ss:$8 sm:$0xf] %vm3_vm0, %v142_v1   ;;  %134 = vst.msk [vmem:[%s329_s1 + $0x40] ss:$8 sm:$0xf0] %vm3_vm0, %v142_v1  }
   0x4   :  { %s181_s21 = smov 88   ;;  %s182_s22 = smov 80  }
   0x5   :  { %s183_s23 = smov 72  }
   0x6   :  { %40 = vrot.lane.b32.xlu1 %v142_v1, %s177_s0  ;;  %23 = vrot.lane.b32.xlu0 %v142_v1, %s178_s10 }
   0xa   :  { %57 = vrot.lane.b32.xlu1 %v142_v1, %s179_s19  ;;  %48 = vrot.lane.b32.xlu0 %v30_v0, %s179_s19 }
   0xe   :  { %74 = vrot.lane.b32.xlu1 %v142_v1, %s180_s20  ;;  %65 = vrot.lane.b32.xlu0 %v30_v0, %s180_s20 }
  0x12   :  { %91 = vrot.lane.b32.xlu1 %v142_v1, %s181_s21  ;;  %82 = vrot.lane.b32.xlu0 %v30_v0, %s181_s21 }
  0x16   :  { %108 = vrot.lane.b32.xlu1 %v142_v1, %s182_s22  ;;  %99 = vrot.lane.b32.xlu0 %v30_v0, %s182_s22 }
  0x1a   :  { %125 = vrot.lane.b32.xlu1 %v142_v1, %s183_s23  ;;  %116 = vrot.lane.b32.xlu0 %v30_v0, %s183_s23 }
  0x74   :  { %v32_v2 = vpop.permute.xlu1 %31   ;;  %v15_v3 = vpop.permute.xlu0 %14  }
  0x75   :  { %140 = vst.msk [vmem:[%s329_s1 + $0x2] ss:$8 sm:$0xf] %vm3_vm0, %v32_v2   ;;  %141 = vst.msk [vmem:[%s329_s1 + $0x2] ss:$8 sm:$0xf0] %vm3_vm0, %v32_v2  }
  0x76   :  { %135 = vst.msk [vmem:[%s329_s1 + $0x1] ss:$8 sm:$0xf] %vm3_vm0, %v15_v3   ;;  %136 = vst.msk [vmem:[%s329_s1 + $0x1] ss:$8 sm:$0xf0] %vm3_vm0, %v15_v3  }
  0x78   :  { %v41_v4 = vpop.permute.xlu1 %40   ;;  %v24_v5 = vpop.permute.xlu0 %23  }
  0x79   :  { %143 = vst.msk [vmem:[%s329_s1 + $0x42] ss:$8 sm:$0xf] %vm3_vm0, %v41_v4   ;;  %144 = vst.msk [vmem:[%s329_s1 + $0x42] ss:$8 sm:$0xf0] %vm3_vm0, %v41_v4  }
  0x7a   :  { %138 = vst.msk [vmem:[%s329_s1 + $0x41] ss:$8 sm:$0xf] %vm3_vm0, %v24_v5   ;;  %139 = vst.msk [vmem:[%s329_s1 + $0x41] ss:$8 sm:$0xf0] %vm3_vm0, %v24_v5  }
  0x7c   :  { %v58_v6 = vpop.permute.xlu1 %57   ;;  %v49_v7 = vpop.permute.xlu0 %48  }
  0x7d   :  { %148 = vst.msk [vmem:[%s329_s1 + $0x43] ss:$8 sm:$0xf] %vm3_vm0, %v58_v6   ;;  %149 = vst.msk [vmem:[%s329_s1 + $0x43] ss:$8 sm:$0xf0] %vm3_vm0, %v58_v6  }
  0x7e   :  { %145 = vst.msk [vmem:[%s329_s1 + $0x3] ss:$8 sm:$0xf] %vm3_vm0, %v49_v7   ;;  %146 = vst.msk [vmem:[%s329_s1 + $0x3] ss:$8 sm:$0xf0] %vm3_vm0, %v49_v7  }
  0x80   :  { %v75_v8 = vpop.permute.xlu1 %74   ;;  %v66_v9 = vpop.permute.xlu0 %65  }
  0x81   :  { %153 = vst.msk [vmem:[%s329_s1 + $0x44] ss:$8 sm:$0xf] %vm3_vm0, %v75_v8   ;;  %154 = vst.msk [vmem:[%s329_s1 + $0x44] ss:$8 sm:$0xf0] %vm3_vm0, %v75_v8  }
  0x82   :  { %150 = vst.msk [vmem:[%s329_s1 + $0x4] ss:$8 sm:$0xf] %vm3_vm0, %v66_v9   ;;  %151 = vst.msk [vmem:[%s329_s1 + $0x4] ss:$8 sm:$0xf0] %vm3_vm0, %v66_v9  }
  0x84   :  { %v92_v10 = vpop.permute.xlu1 %91   ;;  %v83_v11 = vpop.permute.xlu0 %82  }
  0x85   :  { %158 = vst.msk [vmem:[%s329_s1 + $0x45] ss:$8 sm:$0xf] %vm3_vm0, %v92_v10   ;;  %159 = vst.msk [vmem:[%s329_s1 + $0x45] ss:$8 sm:$0xf0] %vm3_vm0, %v92_v10  }
  0x86   :  { %155 = vst.msk [vmem:[%s329_s1 + $0x5] ss:$8 sm:$0xf] %vm3_vm0, %v83_v11   ;;  %156 = vst.msk [vmem:[%s329_s1 + $0x5] ss:$8 sm:$0xf0] %vm3_vm0, %v83_v11  }
  0x88   :  { %v109_v12 = vpop.permute.xlu1 %108   ;;  %v100_v13 = vpop.permute.xlu0 %99  }
  0x89   :  { %163 = vst.msk [vmem:[%s329_s1 + $0x46] ss:$8 sm:$0xf] %vm3_vm0, %v109_v12   ;;  %164 = vst.msk [vmem:[%s329_s1 + $0x46] ss:$8 sm:$0xf0] %vm3_vm0, %v109_v12  }
  0x8a   :  { %160 = vst.msk [vmem:[%s329_s1 + $0x6] ss:$8 sm:$0xf] %vm3_vm0, %v100_v13   ;;  %161 = vst.msk [vmem:[%s329_s1 + $0x6] ss:$8 sm:$0xf0] %vm3_vm0, %v100_v13  }
  0x8c   :  { %v126_v14 = vpop.permute.xlu1 %125   ;;  %v117_v15 = vpop.permute.xlu0 %116  }
  0x8d   :  { %168 = vst.msk [vmem:[%s329_s1 + $0x47] ss:$8 sm:$0xf] %vm3_vm0, %v126_v14   ;;  %169 = vst.msk [vmem:[%s329_s1 + $0x47] ss:$8 sm:$0xf0] %vm3_vm0, %v126_v14  }
  0x8e   :  { %165 = vst.msk [vmem:[%s329_s1 + $0x7] ss:$8 sm:$0xf] %vm3_vm0, %v117_v15   ;;  %166 = vst.msk [vmem:[%s329_s1 + $0x7] ss:$8 sm:$0xf0] %vm3_vm0, %v117_v15  }

</bundles_post_ra>
